<compile_context>
chip_gen: v7x
topology: tpu7x:2x2x1
jax: 0.10.0
libtpu: 0.0.40
codegen_flags: <defaults>
</compile_context>

<pallas_src>
import functools

import jax
import jax.numpy as jnp
from jax.experimental import pallas as pl
from jax.experimental.pallas import tpu as pltpu


def _round_up(x, m):
    return ((x + m - 1) // m) * m


def _scores_kernel(k_ref, w_ref, rb_ref, out_ref, *, n_valid):
    """Per-tile raw scores e = tanh(K_tile . u + c), written lane-dense."""
    tile_n, dk = k_ref.shape

    # Tiny per-tile reductions over the resident parameters (df*dk VPU ops).
    r_col = rb_ref[:, 0:1]                                       # (df, 1) f32
    u = jnp.sum(w_ref[...] * r_col, axis=0, keepdims=True)       # (1, dk) = (W^T r)^T
    c = jnp.sum(rb_ref[:, 1:2] * r_col)                          # scalar  = b . r

    # s = u . K_tile^T -> (1, tile_n): sequence positions on the LANE axis.
    # lhs is broadcast to the sublane quantum (8) so the MXU sees a well-formed
    # (8, dk) x (tile_n, dk)^T product; row 0 is the mat-vec we need.
    u8 = jnp.broadcast_to(u, (8, dk)).astype(k_ref.dtype)
    s = jax.lax.dot_general(
        u8, k_ref[...],
        dimension_numbers=(((1,), (1,)), ((), ())),
        preferred_element_type=jnp.float32,
    )[0:1, :]                                                    # (1, tile_n) f32

    e = jnp.tanh(s + c)                                          # (1, tile_n) f32

    if n_valid % tile_n != 0:
        # Only the tail tile contains columns >= N (undefined K rows from the
        # partial block). Mask them to -1e30 so the softmax kernel never sees
        # garbage; full tiles skip the iota/compare/select entirely.
        n = pl.program_id(0)
        n_last = pl.num_programs(0) - 1

        @pl.when(n == n_last)
        def _():
            col = n * tile_n + jax.lax.broadcasted_iota(
                jnp.int32, (1, tile_n), 1)
            out_ref[...] = jnp.where(col < n_valid, e, jnp.float32(-1e30))

        @pl.when(n < n_last)
        def _():
            out_ref[...] = e
    else:
        out_ref[...] = e


def _softmax_kernel(e_ref, a_ref):
    """Exact softmax over the whole (1, n_pad) score buffer (tail = -1e30)."""
    e = e_ref[...]
    m = jnp.max(e)
    p = jnp.exp(e - m)                # masked tail -> exp(-1e30 - m) == 0
    a_ref[...] = p / jnp.sum(p)


def activated_general(r, K, W, b, *, tile_n=None):
    """r: (df,), K: (N, dk), W: (df, dk) [torch nn.Linear weight], b: (df,).
    Returns a: (N,) = softmax_N( tanh((K @ W.T + b) @ r) )."""
    N, dk = K.shape
    df, dk_w = W.shape
    assert dk == dk_w and r.shape == (df,) and b.shape == (df,)

    itemsize = jnp.dtype(K.dtype).itemsize
    if tile_n is None:
        # Target ~1 MiB of K per grid step so the pipeline runs near the HBM
        # roofline instead of being per-step-overhead dominated.
        tile_n = max(512, min(8192, (1 << 20) // max(dk * itemsize, 1)))

    if N <= tile_n:
        tn = _round_up(N, 8)          # single (possibly partial) tile
    else:
        tn = _round_up(tile_n, 128)   # lane-aligned streamed tiles
    n_tiles = pl.cdiv(N, tn)
    n_pad = n_tiles * tn

    # Fuse r and b into one resident (df, 2) operand (halves the lane-padded
    # (df, 1) VMEM/DMA overhead). Parameters stay f32; K streams in its dtype.
    rb = jnp.stack([r.astype(jnp.float32), b.astype(jnp.float32)], axis=1)
    W_f = W.astype(jnp.float32)

    kernel = functools.partial(_scores_kernel, n_valid=N)

    cost = pl.CostEstimate(
        flops=2 * N * dk + 2 * n_tiles * df * (dk + 1),
        transcendentals=N,
        bytes_accessed=N * dk * itemsize + n_pad * 4 + df * (dk + 2) * 4,
    )

    scores = pl.pallas_call(
        kernel,
        out_shape=jax.ShapeDtypeStruct((1, n_pad), jnp.float32),
        grid=(n_tiles,),
        in_specs=[
            pl.BlockSpec((tn, dk), lambda n: (n, 0)),    # K: streamed, unpadded
            pl.BlockSpec((df, dk), lambda n: (0, 0)),    # W: resident
            pl.BlockSpec((df, 2), lambda n: (0, 0)),     # [r | b]: resident
        ],
        # Each grid step owns a distinct lane-dense (1, tn) slab of the scores.
        out_specs=pl.BlockSpec((1, tn), lambda n: (0, n)),
        compiler_params=pltpu.CompilerParams(
            dimension_semantics=("parallel",),           # megacore-shardable
            vmem_limit_bytes=32 * 1024 * 1024,
        ),
        cost_estimate=cost,
    )(K, W_f, rb)

    # Exact softmax over the tiny score vector (single-block kernel; the score
    # buffer is O(N) f32, negligible next to the K stream).
    probs = pl.pallas_call(
        _softmax_kernel,
        out_shape=jax.ShapeDtypeStruct((1, n_pad), jnp.float32),
    )(scores)

    return probs[0, :N]


def _reference(r, K, W, b):
    hp = jax.lax.Precision.HIGHEST
    h = jax.lax.dot_general(K, W, (((1,), (1,)), ((), ())), precision=hp)
    h = h + b[None, :]
    e = jnp.tanh(jnp.einsum("nf,f->n", h, r, precision=hp))   # tanh AFTER @ r
    e = e - jnp.max(e)
    p = jnp.exp(e)
    return p / jnp.sum(p)


if __name__ == "__main__":
    key = jax.random.PRNGKey(0)
    k1, k2, k3, k4, k5 = jax.random.split(key, 5)

    # --- shapes native to the module: small seq, dk = df = 32 ---------------
    N, dk, df = 8, 32, 32
    K = jax.random.normal(k1, (N, dk), dtype=jnp.float32)
    r = jax.random.normal(k2, (df,), dtype=jnp.float32)
    W = jax.random.normal(k3, (df, dk), dtype=jnp.float32) * 0.1  # torch Linear weight
    b = jax.random.normal(k4, (df,), dtype=jnp.float32) * 0.1

    a = jax.block_until_ready(activated_general(r, K, W, b))
    a_ref = _reference(r, K, W, b)
    assert a.shape == (N,)
    assert jnp.allclose(jnp.sum(a), 1.0, atol=1e-5)
    assert jnp.allclose(a, a_ref, atol=1e-5, rtol=1e-4), (a, a_ref)

    # --- larger ragged sequence, default (single big tile) path -------------
    N2, dk2, df2 = 1000, 64, 48
    K2 = jax.random.normal(k5, (N2, dk2), dtype=jnp.float32)
    r2 = jax.random.normal(k2, (df2,), dtype=jnp.float32)
    W2 = jax.random.normal(k3, (df2, dk2), dtype=jnp.float32) * 0.1
    b2 = jax.random.normal(k4, (df2,), dtype=jnp.float32) * 0.1

    a2 = jax.block_until_ready(activated_general(r2, K2, W2, b2))
    a2_ref = _reference(r2, K2, W2, b2)
    assert a2.shape == (N2,)
    assert jnp.allclose(jnp.sum(a2), 1.0, atol=1e-5)
    assert jnp.allclose(a2, a2_ref, atol=1e-5, rtol=1e-4), (
        float(jnp.max(jnp.abs(a2 - a2_ref))))

    # --- force the multi-tile / masked-tail streamed path -------------------
    a2t = jax.block_until_ready(activated_general(r2, K2, W2, b2, tile_n=256))
    assert a2t.shape == (N2,)
    assert jnp.allclose(jnp.sum(a2t), 1.0, atol=1e-5)
    assert jnp.allclose(a2t, a2_ref, atol=1e-5, rtol=1e-4), (
        float(jnp.max(jnp.abs(a2t - a2_ref))))

    # --- bf16 K stream (halves HBM bytes); smoke check only -----------------
    a2b = jax.block_until_ready(
        activated_general(r2, K2.astype(jnp.bfloat16), W2, b2, tile_n=256))
    assert a2b.shape == (N2,)
    assert bool(jnp.all(jnp.isfinite(a2b)))
    assert jnp.allclose(jnp.sum(a2b), 1.0, atol=1e-3)

    print("KERNEL_OK")
</pallas_src>

<mosaic_0001>
module attributes {stable_mosaic.version = 11 : i64} {
  func.func @_scores_kernel(%arg0: i32, %arg1: memref<8x32xf32, #tpu.memory_space<vmem>>, %arg2: memref<32x32xf32, #tpu.memory_space<vmem>>, %arg3: memref<32x2xf32, #tpu.memory_space<vmem>>, %arg4: memref<1x8xf32, #tpu.memory_space<vmem>>) attributes {dimension_semantics = [#tpu.dimension_semantics<parallel>], iteration_bounds = array<i64: 1>, scalar_prefetch = 0 : i64, scratch_operands = 0 : i64, tpu.core_type = #tpu.core_type<tc>, window_params = [{transform_indices = @transform_0, window_bounds = array<i64: 8, 32>}, {pipeline_mode = #tpu.pipeline_mode<synchronous>, transform_indices = @transform_1, window_bounds = array<i64: 32, 32>}, {pipeline_mode = #tpu.pipeline_mode<synchronous>, transform_indices = @transform_2, window_bounds = array<i64: 32, 2>}, {transform_indices = @transform_3, window_bounds = array<i64: 1, 8>}]} {
    %c0 = arith.constant 0 : index
    %c0_0 = arith.constant 0 : index
    %0 = vector.load %arg3[%c0, %c0_0] : memref<32x2xf32, #tpu.memory_space<vmem>>, vector<32x1xf32>
    %c0_1 = arith.constant 0 : index
    %c0_2 = arith.constant 0 : index
    %1 = vector.load %arg2[%c0_1, %c0_2] : memref<32x32xf32, #tpu.memory_space<vmem>>, vector<32x32xf32>
    %2 = vector.broadcast %0 : vector<32x1xf32> to vector<32x32xf32>
    %3 = arith.mulf %1, %2 : vector<32x32xf32>
    %cst = arith.constant dense<0.000000e+00> : vector<32xf32>
    %4 = vector.multi_reduction <add>, %3, %cst [0] : vector<32x32xf32> to vector<32xf32>
    %5 = vector.shape_cast %4 : vector<32xf32> to vector<1x32xf32>
    %c0_3 = arith.constant 0 : index
    %c1 = arith.constant 1 : index
    %6 = vector.load %arg3[%c0_3, %c1] : memref<32x2xf32, #tpu.memory_space<vmem>>, vector<32x1xf32>
    %7 = arith.mulf %6, %0 : vector<32x1xf32>
    %8 = vector.shape_cast %7 : vector<32x1xf32> to vector<1x32x1xf32>
    %cst_4 = arith.constant dense<0.000000e+00> : vector<1xf32>
    %9 = vector.multi_reduction <add>, %8, %cst_4 [1, 2] : vector<1x32x1xf32> to vector<1xf32>
    %10 = vector.shape_cast %9 : vector<1xf32> to vector<1x1x1xf32>
    %11 = vector.extract %10[0, 0, 0] : f32 from vector<1x1x1xf32>
    %12 = vector.shape_cast %5 : vector<1x32xf32> to vector<1x32xf32>
    %13 = vector.broadcast %12 : vector<1x32xf32> to vector<8x32xf32>
    %c0_5 = arith.constant 0 : index
    %c0_6 = arith.constant 0 : index
    %14 = vector.load %arg1[%c0_5, %c0_6] : memref<8x32xf32, #tpu.memory_space<vmem>>, vector<8x32xf32>
    %cst_7 = arith.constant dense<0.000000e+00> : vector<8x8xf32>
    %15 = tpu.matmul %13, %14, %cst_7 {dimension_numbers = #tpu.dot_dimension_numbers<[1], [1], [0], [0], [0, 0, 1, 0], [], []>} : vector<8x32xf32>, vector<8x32xf32>, vector<8x8xf32> -> vector<8x8xf32>
    %16 = vector.extract_strided_slice %15 {offsets = [0, 0], sizes = [1, 8], strides = [1, 1]} : vector<8x8xf32> to vector<1x8xf32>
    %17 = vector.broadcast %11 : f32 to vector<1x8xf32>
    %18 = arith.addf %16, %17 : vector<1x8xf32>
    %19 = math.tanh %18 : vector<1x8xf32>
    %c0_8 = arith.constant 0 : index
    %c0_9 = arith.constant 0 : index
    %20 = vector.load %arg4[%c0_8, %c0_9] : memref<1x8xf32, #tpu.memory_space<vmem>>, vector<1x8xf32>
    tpu.vector_store %arg4[%c0_8, %c0_9], %19 {strides = array<i32>} : memref<1x8xf32, #tpu.memory_space<vmem>>, vector<1x8xf32>,
    return
  }
  func.func @transform_0(%arg0: i32) -> (i32, i32) {
    %c0_i32 = arith.constant 0 : i32
    %c0_i32_0 = arith.constant 0 : i32
    return %arg0, %c0_i32 : i32, i32
  }
  func.func @transform_1(%arg0: i32) -> (i32, i32) {
    %c0_i32 = arith.constant 0 : i32
    %c0_i32_0 = arith.constant 0 : i32
    %c0_i32_1 = arith.constant 0 : i32
    return %c0_i32, %c0_i32_0 : i32, i32
  }
  func.func @transform_2(%arg0: i32) -> (i32, i32) {
    %c0_i32 = arith.constant 0 : i32
    %c0_i32_0 = arith.constant 0 : i32
    %c0_i32_1 = arith.constant 0 : i32
    return %c0_i32, %c0_i32_0 : i32, i32
  }
  func.func @transform_3(%arg0: i32) -> (i32, i32) {
    %c0_i32 = arith.constant 0 : i32
    %c0_i32_0 = arith.constant 0 : i32
    return %c0_i32, %arg0 : i32, i32
  }
}

</mosaic_0001>

<bundles_post_ra>
// kernel: tpu_custom_call.1
= control target key start
LH: loop header
LB: loop body
LE: loop exit
PB: predicated region body
PF: predicated region fallthrough
CT: control target
= control target key end

     0   :  { %8 = vsyncpa [#allocation3], 0  ;;  %s370_s0 = inlined_call_operand.hbm [shape: f32[8,32], index: 0, kind: input, shape index: {}]   ;;  %s371_s1 = inlined_call_operand.vmem [shape: f32[32,32], index: 1, kind: input, shape index: {}]   ;;  %s372_s2 = inlined_call_operand.vmem [shape: f32[32,2], index: 2, kind: input, shape index: {}]   ;;  %s373_s3 = inlined_call_operand.hbm [shape: f32[1,8], index: 3, kind: output, shape index: {}]  }
   0x1   :  { %9 = vsyncpa [#allocation4], 0  ;;  %s289_s12 = smov [#allocation2]   ;;  %s241_s16 = scalar_lea.hbm %s370_s0, 128 }
   0x2   :  { %s16_s13 = sshll.u32 %s289_s12, 4  ;;  %p242_p0 = scmp.ne.s32.totalorder %s370_s0, %s241_s16  ;;  %s17_s13 = int_to_ptr.vmem [resolvable:$true] %s16_s13 }
   0x3   :  { %p245_p1 = scmp.lt.u32.totalorder %s241_s16, %s370_s0 }
   0x5   :  { %p247_p2 = pnand %p245_p1, %p242_p0 }
   0x7   :  { %250 = shalt.err (!%p247_p2)
}
   0x8   :  { %s251_s21 = scalar_lea.vmem %s17_s13, 128  ;;  %p256_p4 = scmp.lt.s32.totalorder %s17_s13, %s17_s13 }
   0x9   :  { %p252_p3 = scmp.ne.s32.totalorder %s17_s13, %s251_s21  ;;  %p257_p5 = scmp.lt.s32.totalorder %s251_s21, %s251_s21 }
   0xb   :  { %p258_p6 = por %p257_p5, %p256_p4 }
   0xd   :  { %p259_p7 = pnand %p258_p6, %p252_p3 }
   0xf   :  { %262 = shalt.err (!%p259_p7)
}
  0x10   :  { %19 = dma.hbm_to_vmem [thread:$0]  %s370_s0, 128, %s17_s13, [#allocation3]  }
  0x11   :  { %285 = dma.done.wait [#allocation3], 128  }
  0x12   :  { %286 = vsyncadd [#allocation3], 4294967168  ;;  %v290_v0 = vmov 0   ;;  %v29_v1 = vld [vmem:[%s372_s2 + $0x10] sm:$0xff]  ;;  %v27_v2 = vld [vmem:[%s372_s2] sm:$0xff]  ;;  %s291_s4 = smov 1  }
  0x13   :  { %238 = vset.pattern.permute.xlu1 %v290_v0  ;;  %237 = vset.pattern.permute.xlu0 %v290_v0  ;;  %v30_v3 = vld [vmem:[%s372_s2 + $0x18] sm:$0xff]  ;;  %v28_v4 = vld [vmem:[%s372_s2 + $0x8] sm:$0xff]  ;;  %v122_v5 = vld [vmem:[#allocation2] sm:$0xff]  ;;  %vm59_vm0 = vcmask 261120   ;;  %v292_v6 = vmov 0.0   ;;  %vm293_vm1 = vmmov 0  }
  0x14   :  { %47 = vperm.xlu1 %238, %v29_v1   ;;  %37 = vperm.xlu0 %237, %v27_v2   ;;  %v31_v8 = vld [vmem:[%s371_s1] sm:$0xff]  ;;  %v33_v10 = vld [vmem:[%s371_s1 + $0x10] sm:$0xff]  ;;  %v32_v11 = vld [vmem:[%s371_s1 + $0x8] sm:$0xff]  ;;  %vm105_vm2 = vcmask 7168   ;;  %s295_s13 = smov [#allocation5]   ;;  %vm202_vm3 = vcmask 57344  }
  0x15   :  { %223 = vmatprep.subr.mxu0 %v292_v6  ;;  %225 = vmatprep.mubr.msk.f32.mxu0 %vm293_vm1, %v292_v6  ;;  %v34_v13 = vld [vmem:[%s371_s1 + $0x18] sm:$0xff]  ;;  %s294_s1 = smov 127   ;;  %s210_s14 = sshll.u32 %s295_s13, 4  ;;  %s211_s14 = int_to_ptr.vmem [resolvable:$true] %s210_s14 }
  0x16   :  { %224 = vmatpush3.xpose.msk.msra.mxu0 %vm59_vm0, %v122_v5  ;;  %s263_s15 = scalar_lea.vmem %s211_s14, 16  ;;  %s267_s16 = scalar_lea.vmem %s211_s14, 32 }
  0x17   :  { %p264_p8 = scmp.ne.s32.totalorder %s211_s14, %s263_s15  ;;  %p268_p9 = scmp.lt.s32.totalorder %s211_s14, %s211_s14 }
  0x18   :  { %52 = vperm.xlu1 %238, %v30_v3   ;;  %42 = vperm.xlu0 %237, %v28_v4   ;;  %p269_p10 = scmp.lt.s32.totalorder %s267_s16, %s263_s15 }
  0x1a   :  { %p270_p11 = por %p269_p10, %p268_p9 }
  0x1c   :  { %75 = vrot.lane.b32.xlu1 %v28_v4, %s291_s4  ;;  %73 = vrot.lane.b32.xlu0 %v27_v2, %s291_s4  ;;  %p271_p12 = pnand %p270_p11, %p264_p8 }
  0x20   :  { %77 = vrot.lane.b32.xlu0 %v29_v1, %s291_s4  ;;  %79 = vrot.lane.b32.xlu1 %v30_v3, %s291_s4 }
  0x93   :  { %v48_v7 = vpop.permute.xlu1 %47  ;;  %v38_v9 = vpop.permute.xlu0 %37 }
  0x94   :  { %v55_v12 = vmul.f32 %v38_v9, %v31_v8  ;;  %v57_v16 = vmul.f32 %v48_v7, %v33_v10 }
  0x96   :  { %v60_v18 = vsel %vm59_vm0, %v55_v12, 0.0  ;;  %v63_v24 = vsel %vm59_vm0, %v57_v16, 0.0 }
  0x97   :  { %v53_v14 = vpop.permute.xlu1 %52  ;;  %v43_v15 = vpop.permute.xlu0 %42 }
  0x98   :  { %v56_v17 = vmul.f32 %v43_v15, %v32_v11  ;;  %v58_v19 = vmul.f32 %v53_v14, %v34_v13 }
  0x9a   :  { %v61_v20 = vsel %vm59_vm0, %v56_v17, 0.0  ;;  %v65_v28 = vsel %vm59_vm0, %v58_v19, 0.0 }
  0x9b   :  { %v62_v21 = vadd.f32 %v61_v20, %v60_v18  ;;  %v76_v22 = vpop.permute.xlu1 %75  ;;  %v74_v23 = vpop.permute.xlu0 %73 }
  0x9c   :  { %v86_v25 = vmul.f32 %v76_v22, %v28_v4  ;;  %v85_v26 = vmul.f32 %v74_v23, %v27_v2 }
  0x9d   :  { %v64_v27 = vadd.f32 %v63_v24, %v62_v21 }
  0x9e   :  { %95 = vrot.lane.b32.xlu1 %v86_v25, %s294_s1  ;;  %93 = vrot.lane.b32.xlu0 %v85_v26, %s294_s1 }
  0x9f   :  { %v66_v29 = vadd.f32 %v65_v28, %v64_v27  ;;  %v78_v30 = vpop.permute.xlu0 %77  ;;  %v80_v31 = vpop.permute.xlu1 %79 }
  0xa0   :  { %v87_v32 = vmul.f32 %v78_v30, %v29_v1  ;;  %v88_v33 = vmul.f32 %v80_v31, %v30_v3 }
  0xa1   :  { %v67_v34 = vrot.slane %v66_v29, 4 }
  0xa2   :  { %97 = vrot.lane.b32.xlu0 %v87_v32, %s294_s1  ;;  %99 = vrot.lane.b32.xlu1 %v88_v33, %s294_s1 }
  0xa3   :  { %v68_v35 = vadd.f32 %v67_v34, %v66_v29 }
  0xa5   :  { %v69_v36 = vrot.slane %v68_v35, 2 }
  0xa7   :  { %v70_v37 = vadd.f32 %v69_v36, %v68_v35 }
  0xa9   :  { %v71_v38 = vrot.slane %v70_v37, 1 }
  0xab   :  { %v72_v39 = vadd.f32 %v71_v38, %v70_v37 }
  0xad   :  { %226 = vmatmul.mubr.msk.f32.vlgmr.msra.gmra.mrb[0].mxu0 %vm59_vm0, %v72_v39 }
 0x110   :  { %v96_v40 = vpop.permute.xlu1 %95  ;;  %v94_v41 = vpop.permute.xlu0 %93 }
 0x111   :  { %v107_v42 = vsel %vm105_vm2, %v96_v40, 0.0  ;;  %v106_v43 = vsel %vm105_vm2, %v94_v41, 0.0 }
 0x112   :  { %v108_v44 = vadd.f32 %v107_v42, %v106_v43 }
 0x114   :  { %v98_v45 = vpop.permute.xlu0 %97  ;;  %v100_v46 = vpop.permute.xlu1 %99 }
 0x115   :  { %v109_v47 = vsel %vm105_vm2, %v98_v45, 0.0  ;;  %v111_v48 = vsel %vm105_vm2, %v100_v46, 0.0 }
 0x116   :  { %v110_v49 = vadd.f32 %v109_v47, %v108_v44 }
 0x118   :  { %v112_v50 = vadd.f32 %v111_v48, %v110_v49 }
 0x11a   :  { %113 = vadd.xlane.f32.xlu0 %v112_v50 }
 0x180   :  { %v195_v51 = vpop.f32.mrb[0].mxu0 }
 0x181   :  { %v227_v52 = vpop.f32.mrb[1].mxu0 }
 0x1a7   :  { %v114_v53 = vpop.xlane.xlu0 %113 }
 0x1a8   :  { %v115_v54 = vrot.slane %v114_v53, 4 }
 0x1aa   :  { %v116_v55 = vadd.f32 %v115_v54, %v114_v53 }
 0x1ac   :  { %v117_v56 = vrot.slane %v116_v55, 2 }
 0x1ae   :  { %v118_v57 = vadd.f32 %v117_v56, %v116_v55 }
 0x1b0   :  { %v119_v58 = vrot.slane %v118_v57, 1 }
 0x1b2   :  { %v120_v59 = vadd.f32 %v119_v58, %v118_v57 }
 0x1b4   :  { %228 = vpush %v120_v59 }
 0x1e5   :  { %s229_s12 = spop %228 }
 0x1e6   :  { %v199_v60 = vstv %s229_s12 }
 0x1e7   :  { %v200_v61 = vadd.f32 %v199_v60, %v195_v51 }
 0x1e9   :  { %239 = vtanh.f32 %v200_v61 }
 0x1f3   :  { %v240_v62 = vpop.eup %239 }
 0x1f4   :  { %203 = vst.msk [vmem:[#allocation5] sm:$0x1] %vm202_vm3, %v240_v62 }
 0x1f5   :  { %274 = shalt.err (!%p271_p12)
}
 0x1f6   :  { %s275_s19 = scalar_lea.hbm %s373_s3, 16 }
 0x1f7   :  { %p276_p13 = scmp.ne.s32.totalorder %s373_s3, %s275_s19  ;;  %p279_p0 = scmp.lt.u32.totalorder %s275_s19, %s373_s3 }
 0x1f9   :  { %p281_p1 = pnand %p279_p0, %p276_p13 }
 0x1fb   :  { %284 = shalt.err (!%p281_p1)
}
 0x1fc   :  { %213 = dma.vmem_to_hbm [thread:$0]  %s211_s14, 16, %s373_s3, [#allocation4]  }
 0x1fd   :  { %287 = dma.done.wait [#allocation4], 16  }
 0x1fe   :  { %288 = vsyncadd [#allocation4], 4294967280 }
 0x1ff   :  { %217 = vsyncpa [#allocation3], 1 }
 0x200   :  { %218 = vsyncpa [#allocation4], 1 }

</bundles_post_ra>
